<compile_context>
chip_gen: v7x
topology: tpu7x:2x2x1
jax: 0.10.0
libtpu: 0.0.40
codegen_flags: <defaults>
</compile_context>

<pallas_src>
import math

import jax
import jax.numpy as jnp
from jax.experimental import pallas as pl
from jax.experimental.pallas import tpu as pltpu

# ----------------------- "cfg" (synthetic, small) ---------------------------
IN_CHANNELS = 4            # in_channels
RESOLUTION = 4             # cfg.MODEL.ROI_BOX_HEAD.POOLER_RESOLUTION
SCALES = (0.25, 0.125)     # cfg.MODEL.ROI_BOX_HEAD.POOLER_SCALES (2 FPN levels)
SAMPLING_RATIO = 2         # cfg.MODEL.ROI_BOX_HEAD.POOLER_SAMPLING_RATIO
REPRESENTATION_SIZE = 32   # cfg.MODEL.ROI_BOX_HEAD.MLP_HEAD_DIM
HALF_OUT = False
INPUT_SIZE = IN_CHANNELS * RESOLUTION ** 2
OUT_DIM = REPRESENTATION_SIZE // 2 if HALF_OUT else REPRESENTATION_SIZE

LANE = 128                 # lane width / MXU alignment target
TILE_N = 128               # ROI-dim tile (128 is MXU-optimal on v5e; use 256 on v6e/v7x)
TILE_K = 1024              # fc6 reduction tile (capped at padded D)


def _round_up(x, m):
  return ((x + m - 1) // m) * m


# --------------------------- Pooler (JAX glue) -------------------------------
def _assign_levels(rois, k_min, k_max, canonical_scale=224.0, canonical_level=4.0,
                   eps=1e-6):
  widths = rois[:, 3] - rois[:, 1] + 1.0
  heights = rois[:, 4] - rois[:, 2] + 1.0
  s = jnp.sqrt(widths * heights)
  tgt = jnp.floor(canonical_level + jnp.log2(s / canonical_scale + eps))
  tgt = jnp.clip(tgt, k_min, k_max)
  return (tgt - k_min).astype(jnp.int32)


def _roi_align_selected(stacked, rois, levels, scales, heights, widths,
                        output_size, sampling_ratio):
  """ROIAlign (maskrcnn_benchmark legacy, aligned=False), one level per ROI.

  stacked: (L, B, C, Hmax, Wmax) feature maps zero-padded to a common size.
  rois:    (K, 5) [batch_idx, x1, y1, x2, y2].
  levels:  (K,) int32 assigned FPN level per ROI.
  Returns (K, C, output_size, output_size).
  """
  res = output_size
  sr = sampling_ratio
  C = stacked.shape[2]
  Wm = stacked.shape[-1]

  def one_roi(roi, lvl):
    b = roi[0].astype(jnp.int32)
    feat_flat = stacked[lvl, b].reshape(C, -1)            # (C, Hmax*Wmax)
    spatial_scale = scales[lvl]
    H_i = heights[lvl]
    W_i = widths[lvl]
    H_f = H_i.astype(jnp.float32)
    W_f = W_i.astype(jnp.float32)

    roi_start_w = roi[1] * spatial_scale
    roi_start_h = roi[2] * spatial_scale
    roi_end_w = roi[3] * spatial_scale
    roi_end_h = roi[4] * spatial_scale
    roi_w = jnp.maximum(roi_end_w - roi_start_w, 1.0)
    roi_h = jnp.maximum(roi_end_h - roi_start_h, 1.0)
    bin_h = roi_h / res
    bin_w = roi_w / res

    p = jnp.arange(res, dtype=jnp.float32)
    g = jnp.arange(sr, dtype=jnp.float32)
    ys = (roi_start_h + p[:, None] * bin_h + (g[None, :] + 0.5) * bin_h / sr).reshape(-1)
    xs = (roi_start_w + p[:, None] * bin_w + (g[None, :] + 0.5) * bin_w / sr).reshape(-1)
    P = ys.shape[0]
    Q = xs.shape[0]

    valid_y = (ys >= -1.0) & (ys <= H_f)
    valid_x = (xs >= -1.0) & (xs <= W_f)
    yc = jnp.clip(ys, 0.0, H_f - 1.0)
    xc = jnp.clip(xs, 0.0, W_f - 1.0)
    y0 = jnp.floor(yc).astype(jnp.int32)
    x0 = jnp.floor(xc).astype(jnp.int32)
    y1 = jnp.minimum(y0 + 1, H_i - 1)
    x1 = jnp.minimum(x0 + 1, W_i - 1)
    ly = yc - y0.astype(jnp.float32)
    lx = xc - x0.astype(jnp.float32)
    hy = 1.0 - ly
    hx = 1.0 - lx

    # Single flat gather per corner: (C, P*Q) — no Wmax-wide intermediates.
    def corner(yi, xi):
      flat_idx = (yi[:, None] * Wm + xi[None, :]).reshape(-1)   # (P*Q,)
      return feat_flat[:, flat_idx].reshape(C, P, Q)

    v00 = corner(y0, x0)
    v01 = corner(y0, x1)
    v10 = corner(y1, x0)
    v11 = corner(y1, x1)
    val = (v00 * hy[None, :, None] * hx[None, None, :]
           + v01 * hy[None, :, None] * lx[None, None, :]
           + v10 * ly[None, :, None] * hx[None, None, :]
           + v11 * ly[None, :, None] * lx[None, None, :])
    mask = (valid_y[None, :, None] & valid_x[None, None, :]).astype(val.dtype)
    val = val * mask
    return val.reshape(C, res, sr, res, sr).mean(axis=(2, 4))

  return jax.vmap(one_roi)(rois, levels)


def pooler(features, boxes_per_image):
  """features: list of (B, C, Hl, Wl) (NCHW); boxes_per_image: list of (Ki, 4) xyxy."""
  ids = jnp.concatenate(
      [jnp.full((b.shape[0], 1), i, dtype=jnp.float32)
       for i, b in enumerate(boxes_per_image)], axis=0)
  boxes = jnp.concatenate(boxes_per_image, axis=0).astype(jnp.float32)
  rois = jnp.concatenate([ids, boxes], axis=1)            # (K, 5)

  k_min = -int(round(math.log2(SCALES[0])))
  k_max = -int(round(math.log2(SCALES[-1])))
  levels = _assign_levels(rois, float(k_min), float(k_max))

  # Stack per-level maps (zero-padded to the largest spatial size) so each ROI
  # gathers from exactly one level — no per-level recompute/select.
  h_max = max(int(f.shape[2]) for f in features)
  w_max = max(int(f.shape[3]) for f in features)
  padded = [jnp.pad(f, ((0, 0), (0, 0),
                        (0, h_max - f.shape[2]), (0, w_max - f.shape[3])))
            for f in features]
  stacked = jnp.stack(padded, axis=0)                     # (L, B, C, Hmax, Wmax)
  scales = jnp.asarray(SCALES, jnp.float32)
  heights = jnp.asarray([f.shape[2] for f in features], jnp.int32)
  widths = jnp.asarray([f.shape[3] for f in features], jnp.int32)

  return _roi_align_selected(stacked, rois, levels, scales, heights, widths,
                             RESOLUTION, SAMPLING_RATIO)  # (K, C, R, R) NCHW


# --------------------------- Pallas MLP kernel -------------------------------
def _mlp_kernel(x_ref, w6_ref, b6_ref, w7_ref, b7_ref, out_ref, acc_ref):
  k = pl.program_id(1)

  @pl.when(k == 0)
  def _():
    # Fold b6 into the accumulator init (saves one VPU add per row tile).
    acc_ref[...] = jnp.broadcast_to(b6_ref[...], acc_ref.shape)

  acc_ref[...] += jnp.dot(x_ref[...], w6_ref[...],
                          preferred_element_type=jnp.float32)

  @pl.when(k == pl.num_programs(1) - 1)
  def _():
    h = jnp.maximum(acc_ref[...], 0.0).astype(jnp.bfloat16)       # relu(fc6)
    o = jnp.dot(h, w7_ref[...], preferred_element_type=jnp.float32)
    out_ref[...] = jnp.maximum(o + b7_ref[...], 0.0)              # relu(fc7)


def prepare_mlp_params(w6, b6, w7, b7, *, tile_k=TILE_K):
  """One-time padding + bf16 cast of the MLP parameters (hoisted out of forward)."""
  D, H = w6.shape
  O = w7.shape[1]
  h_p = _round_up(H, LANE)
  o_p = _round_up(O, LANE)
  d_p = _round_up(D, LANE)
  tk = min(tile_k, d_p)
  d_p = _round_up(d_p, tk)                                # make tile_k divide d_p

  w6_p = jnp.zeros((d_p, h_p), jnp.bfloat16).at[:D, :H].set(w6.astype(jnp.bfloat16))
  b6_p = jnp.zeros((1, h_p), jnp.float32).at[:, :H].set(b6.reshape(1, -1))
  w7_p = jnp.zeros((h_p, o_p), jnp.bfloat16).at[:H, :O].set(w7.astype(jnp.bfloat16))
  b7_p = jnp.zeros((1, o_p), jnp.float32).at[:, :O].set(b7.reshape(1, -1))
  return dict(w6=w6_p, b6=b6_p, w7=w7_p, b7=b7_p,
              dims=(D, H, O), d_p=d_p, h_p=h_p, o_p=o_p, tile_k=tk)


def mlp_head(x, prep, *, tile_n=TILE_N):
  """x: (N, D_in) float32 -> (N, OUT_DIM) float32, fused fc6+relu+fc7+relu."""
  N, D = x.shape
  D_ref, H, O = prep["dims"]
  assert D == D_ref, "input feature size does not match fc6"
  d_p, h_p, o_p, tile_k = prep["d_p"], prep["h_p"], prep["o_p"], prep["tile_k"]
  n_p = _round_up(max(N, 1), tile_n)

  # Per-call x prep: bf16 cast; pad only dims that actually need it
  # (at production sizes D=12544 is already 128-aligned, so this is cast-only).
  xb = x.astype(jnp.bfloat16)
  if D != d_p:
    xb = jnp.pad(xb, ((0, 0), (0, d_p - D)))
  if N != n_p:
    xb = jnp.pad(xb, ((0, n_p - N), (0, 0)))

  n_tiles = n_p // tile_n
  k_tiles = d_p // tile_k
  grid = (n_tiles, k_tiles)

  flops = 2 * n_p * d_p * h_p + 2 * n_p * h_p * o_p
  bytes_accessed = (n_p * d_p * 2                       # x (bf16)
                    + n_tiles * d_p * h_p * 2           # W6 streamed per row tile
                    + h_p * o_p * 2 + (h_p + o_p) * 4   # W7, biases
                    + n_p * o_p * 4)                    # output (f32)

  out = pl.pallas_call(
      _mlp_kernel,
      out_shape=jax.ShapeDtypeStruct((n_p, o_p), jnp.float32),
      grid=grid,
      in_specs=[
          pl.BlockSpec((tile_n, tile_k), lambda i, k: (i, k)),   # x: (i, k)
          pl.BlockSpec((tile_k, h_p), lambda i, k: (k, 0)),      # W6: K-tiled
          pl.BlockSpec((1, h_p), lambda i, k: (0, 0)),           # b6: invariant
          pl.BlockSpec((h_p, o_p), lambda i, k: (0, 0)),         # W7: invariant
          pl.BlockSpec((1, o_p), lambda i, k: (0, 0)),           # b7: invariant
      ],
      out_specs=pl.BlockSpec((tile_n, o_p), lambda i, k: (i, 0)),
      scratch_shapes=[pltpu.VMEM((tile_n, h_p), jnp.float32)],   # f32 accumulator
      compiler_params=pltpu.CompilerParams(
          dimension_semantics=("parallel", "arbitrary")),        # reduction last
      cost_estimate=pl.CostEstimate(flops=flops, transcendentals=0,
                                    bytes_accessed=bytes_accessed),
  )(xb, prep["w6"], prep["b6"], prep["w7"], prep["b7"])
  return out[:N, :O]


# --------------------------- Parameter init ----------------------------------
def make_fc_params(key, in_dim, out_dim):
  # make_fc: nn.init.kaiming_uniform_(weight, a=1) -> bound = sqrt(3 / fan_in); bias = 0
  bound = math.sqrt(3.0 / in_dim)
  w = jax.random.uniform(key, (in_dim, out_dim), jnp.float32, -bound, bound)
  b = jnp.zeros((out_dim,), jnp.float32)
  return w, b


# --------------------------- Forward (module) --------------------------------
def fpn2mlp_forward(features, proposals, prepared_params, depth_features=None):
  # depth_features path not exercised (d is None) -> returns (x, None) like PyTorch.
  x = pooler(features, proposals)                         # (N, C, R, R)
  x = x.reshape(x.shape[0], -1)                           # torch .view(N, -1)
  x = mlp_head(x, prepared_params)                        # relu(fc6) -> relu(fc7) in Pallas
  return x, None


if __name__ == "__main__":
  key = jax.random.PRNGKey(0)
  k_f0, k_f1, k_w6, k_w7 = jax.random.split(key, 4)

  # FPN feature maps (NCHW), 2 images, 2 levels (image size 160 -> 1/4 and 1/8)
  feat_l0 = jax.random.normal(k_f0, (2, IN_CHANNELS, 40, 40), jnp.float32)
  feat_l1 = jax.random.normal(k_f1, (2, IN_CHANNELS, 20, 20), jnp.float32)
  features = [feat_l0, feat_l1]

  # Proposals: 4 boxes per image, xyxy in image coordinates (mix of scales)
  boxes_img0 = jnp.array([[4.0, 4.0, 36.0, 36.0],
                          [10.0, 20.0, 50.0, 60.0],
                          [0.0, 0.0, 140.0, 140.0],
                          [30.0, 5.0, 60.0, 45.0]], jnp.float32)
  boxes_img1 = jnp.array([[8.0, 8.0, 24.0, 24.0],
                          [5.0, 5.0, 150.0, 155.0],
                          [20.0, 20.0, 100.0, 120.0],
                          [0.0, 40.0, 64.0, 100.0]], jnp.float32)
  proposals = [boxes_img0, boxes_img1]

  # fc6: (INPUT_SIZE -> REPRESENTATION_SIZE), fc7: (REPRESENTATION_SIZE -> OUT_DIM)
  w6, b6 = make_fc_params(k_w6, INPUT_SIZE, REPRESENTATION_SIZE)
  w7, b7 = make_fc_params(k_w7, REPRESENTATION_SIZE, OUT_DIM)
  # One-time weight prep (padding + bf16 cast) — NOT on the per-forward path.
  prepared = prepare_mlp_params(w6, b6, w7, b7)

  out, d = fpn2mlp_forward(features, proposals, prepared)
  out = jax.block_until_ready(out)
  assert out.shape == (8, OUT_DIM) and out.dtype == jnp.float32
  assert bool(jnp.all(out >= 0.0)) and bool(jnp.isfinite(out).all())
  print("KERNEL_OK")
</pallas_src>

<mosaic_0001>
module attributes {stable_mosaic.version = 11 : i64} {
  func.func @_mlp_kernel(%arg0: i32, %arg1: i32, %arg2: memref<128x128xbf16, #tpu.memory_space<vmem>>, %arg3: memref<128x128xbf16, #tpu.memory_space<vmem>>, %arg4: memref<1x128xf32, #tpu.memory_space<vmem>>, %arg5: memref<128x128xbf16, #tpu.memory_space<vmem>>, %arg6: memref<1x128xf32, #tpu.memory_space<vmem>>, %arg7: memref<128x128xf32, #tpu.memory_space<vmem>>, %arg8: memref<128x128xf32, #tpu.memory_space<vmem>>) attributes {dimension_semantics = [#tpu.dimension_semantics<parallel>, #tpu.dimension_semantics<arbitrary>], iteration_bounds = array<i64: 1, 1>, scalar_prefetch = 0 : i64, scratch_operands = 1 : i64, tpu.core_type = #tpu.core_type<tc>, window_params = [{transform_indices = @transform_0, window_bounds = array<i64: 128, 128>}, {transform_indices = @transform_1, window_bounds = array<i64: 128, 128>}, {pipeline_mode = #tpu.pipeline_mode<synchronous>, transform_indices = @transform_2, window_bounds = array<i64: 1, 128>}, {pipeline_mode = #tpu.pipeline_mode<synchronous>, transform_indices = @transform_3, window_bounds = array<i64: 128, 128>}, {pipeline_mode = #tpu.pipeline_mode<synchronous>, transform_indices = @transform_4, window_bounds = array<i64: 1, 128>}, {transform_indices = @transform_5, window_bounds = array<i64: 128, 128>}]} {
    %c0_i32 = arith.constant 0 : i32
    %0 = arith.cmpi eq, %arg1, %c0_i32 : i32
    %1 = arith.extui %0 : i1 to i32
    %c0_i32_0 = arith.constant 0 : i32
    %2 = arith.cmpi ne, %1, %c0_i32_0 : i32
    scf.if %2 {
      %c0_10 = arith.constant 0 : index
      %c0_11 = arith.constant 0 : index
      %12 = vector.load %arg4[%c0_10, %c0_11] : memref<1x128xf32, #tpu.memory_space<vmem>>, vector<1x128xf32>
      %13 = vector.shape_cast %12 : vector<1x128xf32> to vector<1x128xf32>
      %14 = vector.broadcast %13 : vector<1x128xf32> to vector<128x128xf32>
      %c0_12 = arith.constant 0 : index
      %c0_13 = arith.constant 0 : index
      %15 = vector.load %arg8[%c0_12, %c0_13] : memref<128x128xf32, #tpu.memory_space<vmem>>, vector<128x128xf32>
      tpu.vector_store %arg8[%c0_12, %c0_13], %14 {strides = array<i32>} : memref<128x128xf32, #tpu.memory_space<vmem>>, vector<128x128xf32>,
    } else {
    }
    %c0 = arith.constant 0 : index
    %c0_1 = arith.constant 0 : index
    %3 = vector.load %arg8[%c0, %c0_1] : memref<128x128xf32, #tpu.memory_space<vmem>>, vector<128x128xf32>
    %c0_2 = arith.constant 0 : index
    %c0_3 = arith.constant 0 : index
    %4 = vector.load %arg2[%c0_2, %c0_3] : memref<128x128xbf16, #tpu.memory_space<vmem>>, vector<128x128xbf16>
    %c0_4 = arith.constant 0 : index
    %c0_5 = arith.constant 0 : index
    %5 = vector.load %arg3[%c0_4, %c0_5] : memref<128x128xbf16, #tpu.memory_space<vmem>>, vector<128x128xbf16>
    %cst = arith.constant dense<0.000000e+00> : vector<128x128xf32>
    %6 = tpu.matmul %4, %5, %cst {dimension_numbers = #tpu.dot_dimension_numbers<[1], [0], [0], [1], [0, 0, 1, 1], [], []>} : vector<128x128xbf16>, vector<128x128xbf16>, vector<128x128xf32> -> vector<128x128xf32>
    %7 = arith.addf %3, %6 : vector<128x128xf32>
    %c0_6 = arith.constant 0 : index
    %c0_7 = arith.constant 0 : index
    %8 = vector.load %arg8[%c0_6, %c0_7] : memref<128x128xf32, #tpu.memory_space<vmem>>, vector<128x128xf32>
    tpu.vector_store %arg8[%c0_6, %c0_7], %7 {strides = array<i32>} : memref<128x128xf32, #tpu.memory_space<vmem>>, vector<128x128xf32>,
    %c0_i32_8 = arith.constant 0 : i32
    %9 = arith.cmpi eq, %arg1, %c0_i32_8 : i32
    %10 = arith.extui %9 : i1 to i32
    %c0_i32_9 = arith.constant 0 : i32
    %11 = arith.cmpi ne, %10, %c0_i32_9 : i32
    scf.if %11 {
      %c0_10 = arith.constant 0 : index
      %c0_11 = arith.constant 0 : index
      %12 = vector.load %arg8[%c0_10, %c0_11] : memref<128x128xf32, #tpu.memory_space<vmem>>, vector<128x128xf32>
      %cst_12 = arith.constant 0.000000e+00 : f32
      %13 = vector.broadcast %cst_12 : f32 to vector<128x128xf32>
      %14 = arith.maximumf %12, %13 : vector<128x128xf32>
      %15 = arith.truncf %14 : vector<128x128xf32> to vector<128x128xbf16>
      %c0_13 = arith.constant 0 : index
      %c0_14 = arith.constant 0 : index
      %16 = vector.load %arg5[%c0_13, %c0_14] : memref<128x128xbf16, #tpu.memory_space<vmem>>, vector<128x128xbf16>
      %cst_15 = arith.constant dense<0.000000e+00> : vector<128x128xf32>
      %17 = tpu.matmul %15, %16, %cst_15 {dimension_numbers = #tpu.dot_dimension_numbers<[1], [0], [0], [1], [0, 0, 1, 1], [], []>} : vector<128x128xbf16>, vector<128x128xbf16>, vector<128x128xf32> -> vector<128x128xf32>
      %c0_16 = arith.constant 0 : index
      %c0_17 = arith.constant 0 : index
      %18 = vector.load %arg6[%c0_16, %c0_17] : memref<1x128xf32, #tpu.memory_space<vmem>>, vector<1x128xf32>
      %19 = vector.broadcast %18 : vector<1x128xf32> to vector<128x128xf32>
      %20 = arith.addf %17, %19 : vector<128x128xf32>
      %cst_18 = arith.constant 0.000000e+00 : f32
      %21 = vector.broadcast %cst_18 : f32 to vector<128x128xf32>
      %22 = arith.maximumf %20, %21 : vector<128x128xf32>
      %c0_19 = arith.constant 0 : index
      %c0_20 = arith.constant 0 : index
      %23 = vector.load %arg7[%c0_19, %c0_20] : memref<128x128xf32, #tpu.memory_space<vmem>>, vector<128x128xf32>
      tpu.vector_store %arg7[%c0_19, %c0_20], %22 {strides = array<i32>} : memref<128x128xf32, #tpu.memory_space<vmem>>, vector<128x128xf32>,
    } else {
    }
    return
  }
  func.func @transform_0(%arg0: i32, %arg1: i32) -> (i32, i32) {
    %c0_i32 = arith.constant 0 : i32
    return %arg0, %arg1 : i32, i32
  }
  func.func @transform_1(%arg0: i32, %arg1: i32) -> (i32, i32) {
    %c0_i32 = arith.constant 0 : i32
    %c0_i32_0 = arith.constant 0 : i32
    return %arg1, %c0_i32 : i32, i32
  }
  func.func @transform_2(%arg0: i32, %arg1: i32) -> (i32, i32) {
    %c0_i32 = arith.constant 0 : i32
    %c0_i32_0 = arith.constant 0 : i32
    %c0_i32_1 = arith.constant 0 : i32
    return %c0_i32, %c0_i32_0 : i32, i32
  }
  func.func @transform_3(%arg0: i32, %arg1: i32) -> (i32, i32) {
    %c0_i32 = arith.constant 0 : i32
    %c0_i32_0 = arith.constant 0 : i32
    %c0_i32_1 = arith.constant 0 : i32
    return %c0_i32, %c0_i32_0 : i32, i32
  }
  func.func @transform_4(%arg0: i32, %arg1: i32) -> (i32, i32) {
    %c0_i32 = arith.constant 0 : i32
    %c0_i32_0 = arith.constant 0 : i32
    %c0_i32_1 = arith.constant 0 : i32
    return %c0_i32, %c0_i32_0 : i32, i32
  }
  func.func @transform_5(%arg0: i32, %arg1: i32) -> (i32, i32) {
    %c0_i32 = arith.constant 0 : i32
    %c0_i32_0 = arith.constant 0 : i32
    return %arg0, %c0_i32 : i32, i32
  }
}

</mosaic_0001>

<bundles_post_ra>
// kernel: tpu_custom_call.1
= control target key start
LH: loop header
LB: loop body
LE: loop exit
PB: predicated region body
PF: predicated region fallthrough
CT: control target
= control target key end

     0   :  { %10 = vsyncpa [#allocation4], 0  ;;  %s980_s0 = inlined_call_operand.hbm [shape: bf16[128,128], index: 0, kind: input, shape index: {}]   ;;  %s981_s1 = inlined_call_operand.hbm [shape: bf16[128,128], index: 1, kind: input, shape index: {}]   ;;  %s982_s2 = inlined_call_operand.vmem [shape: f32[1,128], index: 2, kind: input, shape index: {}]   ;;  %s983_s3 = inlined_call_operand.hbm [shape: bf16[128,128], index: 3, kind: input, shape index: {}]   ;;  %s984_s4 = inlined_call_operand.vmem [shape: f32[1,128], index: 4, kind: input, shape index: {}]   ;;  %s985_s5 = inlined_call_operand.hbm [shape: f32[128,128], index: 5, kind: output, shape index: {}]  }
   0x1   :  { %11 = vsyncpa [#allocation7], 0 }
   0x2   :  { %12 = vsyncpa [#allocation5], 0  ;;  %s872_s18 = smov [#allocation6]   ;;  %s873_s20 = smov [#allocation3]  }
   0x3   :  { %s30_s19 = sshll.u32 %s872_s18, 4  ;;  %s18_s21 = sshll.u32 %s873_s20, 4  ;;  %s31_s19 = int_to_ptr.vmem [resolvable:$true] %s30_s19  ;;  %s910_s21 = int_to_ptr.vmem [resolvable:$true] %s18_s21 }
   0x4   :  { %s778_s24 = scalar_lea.hbm %s981_s1, 1024 }
   0x5   :  { %p779_p0 = scmp.ne.s32.totalorder %s981_s1, %s778_s24  ;;  %p782_p1 = scmp.lt.u32.totalorder %s778_s24, %s981_s1 }
   0x7   :  { %p784_p2 = pnand %p782_p1, %p779_p0 }
   0x9   :  { %787 = shalt.err (!%p784_p2)
}
   0xa   :  { %s788_s29 = scalar_lea.vmem %s31_s19, 1024  ;;  %p793_p4 = scmp.lt.s32.totalorder %s31_s19, %s31_s19 }
   0xb   :  { %p789_p3 = scmp.ne.s32.totalorder %s31_s19, %s788_s29  ;;  %p794_p5 = scmp.lt.s32.totalorder %s788_s29, %s788_s29 }
   0xd   :  { %p795_p6 = por %p794_p5, %p793_p4 }
   0xf   :  { %p796_p7 = pnand %p795_p6, %p789_p3 }
  0x11   :  { %799 = shalt.err (!%p796_p7)
}
  0x12   :  { %s874_s30 = smov 64   ;;  %s875_s6 = smov 4  }
  0x13   :  { %36 = dma.hbm_to_vmem [thread:$0]  %s981_s1, 1024, %s31_s19, [#allocation7], %s874_s30, %s874_s30, %s875_s6  }
  0x14   :  { %s800_s11 = scalar_lea.hbm %s980_s0, 1024 }
  0x15   :  { %p801_p8 = scmp.ne.s32.totalorder %s980_s0, %s800_s11  ;;  %p804_p9 = scmp.lt.u32.totalorder %s800_s11, %s980_s0 }
  0x17   :  { %p806_p10 = pnand %p804_p9, %p801_p8 }
  0x19   :  { %809 = shalt.err (!%p806_p10)
}
  0x1a   :  { %s810_s16 = scalar_lea.vmem %s910_s21, 1024  ;;  %p815_p12 = scmp.lt.s32.totalorder %s910_s21, %s910_s21 }
  0x1b   :  { %p811_p11 = scmp.ne.s32.totalorder %s910_s21, %s810_s16  ;;  %p816_p13 = scmp.lt.s32.totalorder %s810_s16, %s810_s16 }
  0x1d   :  { %p817_p0 = por %p816_p13, %p815_p12 }
  0x1f   :  { %p818_p1 = pnand %p817_p0, %p811_p11 }
  0x21   :  { %821 = shalt.err (!%p818_p1)
}
  0x22   :  { %24 = dma.hbm_to_vmem [thread:$0]  %s980_s0, 1024, %s910_s21, [#allocation4], %s874_s30, %s874_s30, %s875_s6  }
  0x23   :  { %s876_s18 = smov [#allocation8]   ;;  %s822_s23 = scalar_lea.hbm %s983_s3, 1024 }
  0x24   :  { %s44_s19 = sshll.u32 %s876_s18, 4  ;;  %p823_p2 = scmp.ne.s32.totalorder %s983_s3, %s822_s23  ;;  %s45_s19 = int_to_ptr.vmem [resolvable:$true] %s44_s19 }
  0x25   :  { %p826_p3 = scmp.lt.u32.totalorder %s822_s23, %s983_s3 }
  0x27   :  { %p828_p4 = pnand %p826_p3, %p823_p2 }
  0x29   :  { %831 = shalt.err (!%p828_p4)
}
  0x2a   :  { %s832_s28 = scalar_lea.vmem %s45_s19, 1024  ;;  %p837_p6 = scmp.lt.s32.totalorder %s45_s19, %s45_s19 }
  0x2b   :  { %p833_p5 = scmp.ne.s32.totalorder %s45_s19, %s832_s28  ;;  %p838_p7 = scmp.lt.s32.totalorder %s832_s28, %s832_s28 }
  0x2d   :  { %p839_p8 = por %p838_p7, %p837_p6 }
  0x2f   :  { %p840_p9 = pnand %p839_p8, %p833_p5 }
  0x31   :  { %843 = shalt.err (!%p840_p9)
}
  0x32   :  { %50 = dma.hbm_to_vmem [thread:$0]  %s983_s3, 1024, %s45_s19, [#allocation7], %s874_s30, %s874_s30, %s875_s6  }
  0x33   :  { %866 = dma.done.wait [#allocation4], 1024  }
  0x34   :  { %867 = vsyncadd [#allocation4], 4294966272 }
  0x35   :  { %868 = dma.done.wait [#allocation7], 2048  }
  0x36   :  { %869 = vsyncadd [#allocation7], 4294965248  ;;  %v754_v0 = vld [vmem:[#allocation6] sm:$0xff]   ;;  %v755_v1 = vld [vmem:[#allocation6 + $0x8] sm:$0xff]  }
  0x37   :  { %682 = vmatprep.subr.bf16.mxu0 %v754_v0  ;;  %v756_v2 = vld [vmem:[#allocation6 + $0x10] sm:$0xff]   ;;  %v757_v3 = vld [vmem:[#allocation6 + $0x18] sm:$0xff]   ;;  %v762_v4 = vld [vmem:[#allocation3] sm:$0xff]  }
  0x38   :  { %683 = vmatpush3.bf16.msra.mxu0 %v754_v0  ;;  %698 = vmatprep.mubr.bf16.mxu0 %v762_v4  ;;  %v758_v5 = vld [vmem:[#allocation6 + $0x20] sm:$0xff]   ;;  %v759_v6 = vld [vmem:[#allocation6 + $0x28] sm:$0xff]   ;;  %v760_v9 = vld [vmem:[#allocation6 + $0x30] sm:$0xff]  }
  0x39   :  { %684 = vmatprep.subr.bf16.mxu0 %v755_v1  ;;  %v770_v7 = vld [vmem:[#allocation8] sm:$0xff]   ;;  %v771_v8 = vld [vmem:[#allocation8 + $0x8] sm:$0xff]   ;;  %v772_v10 = vld [vmem:[#allocation8 + $0x10] sm:$0xff]  }
  0x3a   :  { %714 = vmatprep.subr.bf16.mxu1 %v770_v7  ;;  %v761_v11 = vld [vmem:[#allocation6 + $0x38] sm:$0xff]   ;;  %v774_v13 = vld [vmem:[#allocation8 + $0x20] sm:$0xff]   ;;  %v763_v14 = vld [vmem:[#allocation3 + $0x8] sm:$0xff]  }
  0x3b   :  { %715 = vmatpush3.bf16.msra.mxu1 %v770_v7  ;;  %v773_v12 = vld [vmem:[#allocation8 + $0x18] sm:$0xff]   ;;  %v764_v15 = vld [vmem:[#allocation3 + $0x10] sm:$0xff]   ;;  %v775_v16 = vld [vmem:[#allocation8 + $0x28] sm:$0xff]  }
  0x3c   :  { %685 = vmatpush3.bf16.msra.mxu0 %v755_v1  ;;  %716 = vmatprep.subr.bf16.mxu1 %v771_v8  ;;  %v765_v17 = vld [vmem:[#allocation3 + $0x18] sm:$0xff]   ;;  %v766_v18 = vld [vmem:[#allocation3 + $0x20] sm:$0xff]   ;;  %v767_v19 = vld [vmem:[#allocation3 + $0x28] sm:$0xff]  }
  0x3d   :  { %686 = vmatprep.subr.bf16.mxu0 %v756_v2  ;;  %v768_v20 = vld [vmem:[#allocation3 + $0x30] sm:$0xff]   ;;  %v769_v21 = vld [vmem:[#allocation3 + $0x38] sm:$0xff]   ;;  %v624_v24 = vld [vmem:[%s982_s2] ss:$0 sm:$0xff] }
  0x3e   :  { %v776_v22 = vld [vmem:[#allocation8 + $0x30] sm:$0xff]   ;;  %v777_v23 = vld [vmem:[#allocation8 + $0x38] sm:$0xff]  }
  0x3f   :  { %717 = vmatpush3.bf16.msra.mxu1 %v771_v8 }
  0x40   :  { %687 = vmatpush3.bf16.msra.mxu0 %v756_v2  ;;  %718 = vmatprep.subr.bf16.mxu1 %v772_v10 }
  0x41   :  { %688 = vmatprep.subr.bf16.mxu0 %v757_v3 }
  0x43   :  { %719 = vmatpush3.bf16.msra.mxu1 %v772_v10 }
  0x44   :  { %689 = vmatpush3.bf16.msra.mxu0 %v757_v3  ;;  %720 = vmatprep.subr.bf16.mxu1 %v773_v12 }
  0x45   :  { %690 = vmatprep.subr.bf16.mxu0 %v758_v5 }
  0x47   :  { %721 = vmatpush3.bf16.msra.mxu1 %v773_v12 }
  0x48   :  { %691 = vmatpush3.bf16.msra.mxu0 %v758_v5  ;;  %722 = vmatprep.subr.bf16.mxu1 %v774_v13 }
  0x49   :  { %692 = vmatprep.subr.bf16.mxu0 %v759_v6 }
  0x4b   :  { %723 = vmatpush3.bf16.msra.mxu1 %v774_v13 }
  0x4c   :  { %693 = vmatpush3.bf16.msra.mxu0 %v759_v6  ;;  %724 = vmatprep.subr.bf16.mxu1 %v775_v16 }
  0x4d   :  { %694 = vmatprep.subr.bf16.mxu0 %v760_v9 }
  0x4f   :  { %725 = vmatpush3.bf16.msra.mxu1 %v775_v16 }
  0x50   :  { %695 = vmatpush3.bf16.msra.mxu0 %v760_v9  ;;  %726 = vmatprep.subr.bf16.mxu1 %v776_v22 }
  0x51   :  { %696 = vmatprep.subr.bf16.mxu0 %v761_v11 }
  0x53   :  { %727 = vmatpush3.bf16.msra.mxu1 %v776_v22 }
  0x54   :  { %697 = vmatpush3.bf16.msra.mxu0 %v761_v11  ;;  %728 = vmatprep.subr.bf16.mxu1 %v777_v23 }
  0x57   :  { %699 = vmatmul.mubr.bf16.vlgmr.msra.gmra.mrb[0].mxu0 %v763_v14  ;;  %729 = vmatpush3.bf16.msra.mxu1 %v777_v23 }
  0x58   :  { %702 = vmatprep.mubr.bf16.mxu0 %v764_v15 }
  0x5f   :  { %703 = vmatmul.mubr.bf16.gmra.mrb[4].mxu0 %v765_v17  ;;  %v641_v17 = vld [vmem:[%s984_s4] ss:$0 sm:$0xff]  ;;  %s877_s4 = smov [#allocation9]  }
  0x60   :  { %706 = vmatprep.mubr.bf16.mxu0 %v766_v18  ;;  %s611_s6 = sshll.u32 %s877_s4, 4  ;;  %s612_s6 = int_to_ptr.vmem [resolvable:$true] %s611_s6 }
  0x61   :  { %s844_s7 = scalar_lea.vmem %s612_s6, 2048  ;;  %p849_p11 = scmp.lt.s32.totalorder %s612_s6, %s612_s6 }
  0x62   :  { %p845_p10 = scmp.ne.s32.totalorder %s612_s6, %s844_s7  ;;  %p850_p12 = scmp.lt.s32.totalorder %s844_s7, %s844_s7 }
  0x64   :  { %p851_p13 = por %p850_p12, %p849_p11 }
  0x66   :  { %p852_p0 = pnand %p851_p13, %p845_p10 }
  0x67   :  { %707 = vmatmul.mubr.bf16.gmra.mrb[8].mxu0 %v767_v19 }
  0x68   :  { %710 = vmatprep.mubr.bf16.mxu0 %v768_v20 }
  0x6f   :  { %711 = vmatmul.mubr.bf16.gmra.mrb[12].mxu0 %v769_v21 }
 0x12a   :  { %v700_v25 = vpop.f32.mrb[0].mxu0 }
 0x12b   :  { %v333_v26 = vadd.f32 %v700_v25, %v624_v24  ;;  %v268_v27 = vpop.f32.mrb[1].mxu0 }
 0x12c   :  { %v331_v28 = vadd.f32 %v624_v24, %v268_v27  ;;  %v701_v29 = vpop.f32.mrb[2].mxu0 }
 0x12d   :  { %v334_v30 = vadd.f32 %v701_v29, %v624_v24  ;;  %v271_v31 = vpop.f32.mrb[3].mxu0  ;;  %v384_v33 = vmax.f32 %v333_v26, 0.0 }
 0x12e   :  { %v332_v32 = vadd.f32 %v624_v24, %v271_v31  ;;  %v382_v35 = vmax.f32 %v331_v28, 0.0 }
 0x12f   :  { %v385_v34 = vmax.f32 %v334_v30, 0.0 }
 0x130   :  { %v383_v36 = vmax.f32 %v332_v32, 0.0 }
 0x131   :  { %v399_v37 = vpack.c.bf16 %v385_v34, %v384_v33 }
 0x132   :  { %v704_v38 = vpop.f32.mrb[4].mxu0  ;;  %v398_v39 = vpack.c.bf16 %v383_v36, %v382_v35 }
 0x133   :  { %v337_v40 = vadd.f32 %v704_v38, %v624_v24  ;;  %v284_v41 = vpop.f32.mrb[5].mxu0 }
 0x134   :  { %v335_v42 = vadd.f32 %v624_v24, %v284_v41  ;;  %v705_v43 = vpop.f32.mrb[6].mxu0  ;;  %730 = vmatprep.mubr.bf16.mxu1 %v398_v39 }
 0x135   :  { %v338_v44 = vadd.f32 %v705_v43, %v624_v24  ;;  %v287_v45 = vpop.f32.mrb[7].mxu0  ;;  %731 = vmatmul.mubr.bf16.vlgmr.msra.gmra.mrb[0].mxu1 %v399_v37  ;;  %v388_v47 = vmax.f32 %v337_v40, 0.0 }
 0x136   :  { %v336_v46 = vadd.f32 %v624_v24, %v287_v45  ;;  %v386_v49 = vmax.f32 %v335_v42, 0.0 }
 0x137   :  { %v389_v48 = vmax.f32 %v338_v44, 0.0 }
 0x138   :  { %v387_v50 = vmax.f32 %v336_v46, 0.0 }
 0x139   :  { %v401_v51 = vpack.c.bf16 %v389_v48, %v388_v47 }
 0x13a   :  { %v400_v52 = vpack.c.bf16 %v387_v50, %v386_v49  ;;  %v708_v53 = vpop.f32.mrb[8].mxu0 }
 0x13b   :  { %v341_v54 = vadd.f32 %v708_v53, %v624_v24  ;;  %v300_v55 = vpop.f32.mrb[9].mxu0 }
 0x13c   :  { %v339_v56 = vadd.f32 %v624_v24, %v300_v55  ;;  %v709_v57 = vpop.f32.mrb[10].mxu0  ;;  %734 = vmatprep.mubr.bf16.mxu1 %v400_v52 }
 0x13d   :  { %v342_v58 = vadd.f32 %v709_v57, %v624_v24  ;;  %v303_v59 = vpop.f32.mrb[11].mxu0  ;;  %735 = vmatmul.mubr.bf16.gmra.mrb[4].mxu1 %v401_v51  ;;  %v392_v61 = vmax.f32 %v341_v54, 0.0 }
 0x13e   :  { %v340_v60 = vadd.f32 %v624_v24, %v303_v59  ;;  %v390_v63 = vmax.f32 %v339_v56, 0.0 }
 0x13f   :  { %v393_v62 = vmax.f32 %v342_v58, 0.0 }
 0x140   :  { %v391_v0 = vmax.f32 %v340_v60, 0.0 }
 0x141   :  { %v403_v1 = vpack.c.bf16 %v393_v62, %v392_v61 }
 0x142   :  { %v402_v2 = vpack.c.bf16 %v391_v0, %v390_v63  ;;  %v712_v3 = vpop.f32.mrb[12].mxu0 }
 0x143   :  { %v345_v4 = vadd.f32 %v712_v3, %v624_v24  ;;  %v316_v5 = vpop.f32.mrb[13].mxu0 }
 0x144   :  { %v343_v6 = vadd.f32 %v624_v24, %v316_v5  ;;  %v713_v7 = vpop.f32.mrb[14].mxu0  ;;  %738 = vmatprep.mubr.bf16.mxu1 %v402_v2 }
 0x145   :  { %v346_v8 = vadd.f32 %v713_v7, %v624_v24  ;;  %v319_v9 = vpop.f32.mrb[15].mxu0  ;;  %739 = vmatmul.mubr.bf16.gmra.mrb[8].mxu1 %v403_v1  ;;  %v396_v11 = vmax.f32 %v345_v4, 0.0 }
 0x146   :  { %v344_v10 = vadd.f32 %v624_v24, %v319_v9  ;;  %v394_v13 = vmax.f32 %v343_v6, 0.0 }
 0x147   :  { %v397_v12 = vmax.f32 %v346_v8, 0.0 }
 0x148   :  { %v395_v14 = vmax.f32 %v344_v10, 0.0 }
 0x149   :  { %v405_v15 = vpack.c.bf16 %v397_v12, %v396_v11 }
 0x14a   :  { %v404_v16 = vpack.c.bf16 %v395_v14, %v394_v13 }
 0x14c   :  { %742 = vmatprep.mubr.bf16.mxu1 %v404_v16 }
 0x14d   :  { %743 = vmatmul.mubr.bf16.gmra.mrb[12].mxu1 %v405_v15 }
 0x208   :  { %v732_v18 = vpop.f32.mrb[0].mxu1 }
 0x209   :  { %v520_v19 = vadd.f32 %v732_v18, %v641_v17  ;;  %v511_v20 = vpop.f32.mrb[1].mxu1 }
 0x20a   :  { %v512_v21 = vadd.f32 %v641_v17, %v511_v20  ;;  %v733_v22 = vpop.f32.mrb[2].mxu1 }
 0x20b   :  { %v576_v23 = vmax.f32 %v520_v19, 0.0  ;;  %v523_v25 = vadd.f32 %v733_v22, %v641_v17  ;;  %v514_v24 = vpop.f32.mrb[3].mxu1 }
 0x20c   :  { %v574_v26 = vmax.f32 %v512_v21, 0.0  ;;  %v515_v27 = vadd.f32 %v641_v17, %v514_v24 }
 0x20d   :  { %592 = vst [vmem:[#allocation9 + $0x10] sm:$0xff] %v576_v23  ;;  %v577_v28 = vmax.f32 %v523_v25, 0.0 }
 0x20e   :  { %590 = vst [vmem:[#allocation9] sm:$0xff] %v574_v26  ;;  %v575_v29 = vmax.f32 %v515_v27, 0.0 }
 0x20f   :  { %593 = vst [vmem:[#allocation9 + $0x18] sm:$0xff] %v577_v28 }
 0x210   :  { %591 = vst [vmem:[#allocation9 + $0x8] sm:$0xff] %v575_v29  ;;  %v736_v30 = vpop.f32.mrb[4].mxu1 }
 0x211   :  { %v536_v31 = vadd.f32 %v736_v30, %v641_v17  ;;  %v527_v32 = vpop.f32.mrb[5].mxu1 }
 0x212   :  { %v528_v33 = vadd.f32 %v641_v17, %v527_v32  ;;  %v737_v34 = vpop.f32.mrb[6].mxu1 }
 0x213   :  { %v580_v35 = vmax.f32 %v536_v31, 0.0  ;;  %v539_v36 = vadd.f32 %v737_v34, %v641_v17  ;;  %v530_v37 = vpop.f32.mrb[7].mxu1 }
 0x214   :  { %v578_v38 = vmax.f32 %v528_v33, 0.0  ;;  %v531_v39 = vadd.f32 %v641_v17, %v530_v37 }
 0x215   :  { %596 = vst [vmem:[#allocation9 + $0x30] sm:$0xff] %v580_v35  ;;  %v581_v40 = vmax.f32 %v539_v36, 0.0 }
 0x216   :  { %594 = vst [vmem:[#allocation9 + $0x20] sm:$0xff] %v578_v38  ;;  %v579_v41 = vmax.f32 %v531_v39, 0.0 }
 0x217   :  { %597 = vst [vmem:[#allocation9 + $0x38] sm:$0xff] %v581_v40 }
 0x218   :  { %595 = vst [vmem:[#allocation9 + $0x28] sm:$0xff] %v579_v41  ;;  %v740_v42 = vpop.f32.mrb[8].mxu1 }
 0x219   :  { %v552_v43 = vadd.f32 %v740_v42, %v641_v17  ;;  %v543_v44 = vpop.f32.mrb[9].mxu1 }
 0x21a   :  { %v544_v45 = vadd.f32 %v641_v17, %v543_v44  ;;  %v741_v46 = vpop.f32.mrb[10].mxu1 }
 0x21b   :  { %v584_v47 = vmax.f32 %v552_v43, 0.0  ;;  %v555_v48 = vadd.f32 %v741_v46, %v641_v17  ;;  %v546_v49 = vpop.f32.mrb[11].mxu1 }
 0x21c   :  { %v582_v50 = vmax.f32 %v544_v45, 0.0  ;;  %v547_v51 = vadd.f32 %v641_v17, %v546_v49 }
 0x21d   :  { %600 = vst [vmem:[#allocation9 + $0x50] sm:$0xff] %v584_v47  ;;  %v585_v52 = vmax.f32 %v555_v48, 0.0 }
 0x21e   :  { %598 = vst [vmem:[#allocation9 + $0x40] sm:$0xff] %v582_v50  ;;  %v583_v53 = vmax.f32 %v547_v51, 0.0 }
 0x21f   :  { %601 = vst [vmem:[#allocation9 + $0x58] sm:$0xff] %v585_v52 }
 0x220   :  { %599 = vst [vmem:[#allocation9 + $0x48] sm:$0xff] %v583_v53  ;;  %v744_v54 = vpop.f32.mrb[12].mxu1 }
 0x221   :  { %v568_v55 = vadd.f32 %v744_v54, %v641_v17  ;;  %v559_v56 = vpop.f32.mrb[13].mxu1 }
 0x222   :  { %v560_v57 = vadd.f32 %v641_v17, %v559_v56  ;;  %v745_v58 = vpop.f32.mrb[14].mxu1 }
 0x223   :  { %v588_v59 = vmax.f32 %v568_v55, 0.0  ;;  %v571_v60 = vadd.f32 %v745_v58, %v641_v17  ;;  %v562_v61 = vpop.f32.mrb[15].mxu1 }
 0x224   :  { %v586_v62 = vmax.f32 %v560_v57, 0.0  ;;  %v563_v63 = vadd.f32 %v641_v17, %v562_v61 }
 0x225   :  { %604 = vst [vmem:[#allocation9 + $0x70] sm:$0xff] %v588_v59  ;;  %v589_v0 = vmax.f32 %v571_v60, 0.0 }
 0x226   :  { %602 = vst [vmem:[#allocation9 + $0x60] sm:$0xff] %v586_v62  ;;  %v587_v1 = vmax.f32 %v563_v63, 0.0 }
 0x227   :  { %605 = vst [vmem:[#allocation9 + $0x78] sm:$0xff] %v589_v0 }
 0x228   :  { %603 = vst [vmem:[#allocation9 + $0x68] sm:$0xff] %v587_v1 }
 0x229   :  { %855 = shalt.err (!%p852_p0)
}
 0x22a   :  { %s856_s10 = scalar_lea.hbm %s985_s5, 2048 }
 0x22b   :  { %p857_p1 = scmp.ne.s32.totalorder %s985_s5, %s856_s10  ;;  %p860_p2 = scmp.lt.u32.totalorder %s856_s10, %s985_s5 }
 0x22d   :  { %p862_p3 = pnand %p860_p2, %p857_p1 }
 0x22f   :  { %865 = shalt.err (!%p862_p3)
}
 0x230   :  { %s878_s15 = smov 128   ;;  %s879_s16 = smov 8  }
 0x231   :  { %617 = dma.vmem_to_hbm [thread:$0]  %s612_s6, 2048, %s985_s5, [#allocation5], %s878_s15, %s878_s15, %s879_s16  }
 0x232   :  { %870 = dma.done.wait [#allocation5], 2048  }
 0x233   :  { %871 = vsyncadd [#allocation5], 4294965248 }
 0x234   :  { %621 = vsyncpa [#allocation4], 1 }
 0x235   :  { %622 = vsyncpa [#allocation7], 1 }
 0x236   :  { %623 = vsyncpa [#allocation5], 1 }

</bundles_post_ra>
